<compile_context>
chip_gen: v7x
topology: tpu7x:2x2x1
jax: 0.10.0
libtpu: 0.0.40
codegen_flags: <defaults>
</compile_context>

<pallas_src>
import functools

import numpy as np
import jax
import jax.numpy as jnp
from jax import lax
from jax.experimental import pallas as pl
from jax.experimental.pallas import tpu as pltpu


def _round_up(x, m):
    return (x + m - 1) // m * m


def _fit_tile(total, preferred, align):
    """Pick a tile for `total`.

    Returns (tile, padded_total).  If total <= preferred, one full block.
    Otherwise prefer the largest `align`-aligned exact divisor <= preferred;
    if none exists, pick the aligned tile that minimizes padding (the wrapper
    pads the array up to padded_total).  Never falls back to an untiled dim.
    """
    if total <= preferred:
        return total, total
    t = max(align, (preferred // align) * align)
    best = None
    while t >= align:
        if total % t == 0:
            return t, total
        padded = _round_up(total, t)
        if best is None or padded < best[1]:
            best = (t, padded)
        t -= align
    return best


# ---------------------------------------------------------------------------
# Kernel 1: edge_func  -> sum over hidden of the ComplEx 4-term product
# ---------------------------------------------------------------------------
def _edge_kernel(h_ref, r_ref, t_ref, o_ref, *, d2):
    h = h_ref[...].astype(jnp.float32)          # (te, D)
    r = r_ref[...].astype(jnp.float32)
    t = t_ref[...].astype(jnp.float32)
    re_h, im_h = h[:, :d2], h[:, d2:]
    re_t, im_t = t[:, :d2], t[:, d2:]
    re_r, im_r = r[:, :d2], r[:, d2:]
    # Factored form of:
    #   re_h*re_t*re_r + im_h*im_t*re_r + re_h*im_t*im_r - im_h*re_t*im_r
    s = re_r * (re_h * re_t + im_h * im_t) + im_r * (re_h * im_t - im_h * re_t)
    o_ref[...] = jnp.sum(s, axis=-1, keepdims=True).astype(o_ref.dtype)


def complex_edge_score(head, rel, tail, target_step_bytes=4 << 20):
    """ComplExScore.edge_func on pre-gathered per-edge embeddings (E, D)."""
    E, D = head.shape
    assert D % 2 == 0, "hidden dim must be even ([real || imag])"
    d2 = D // 2
    itemsize = np.dtype(head.dtype).itemsize

    # Adaptive row tile: ~target_step_bytes of input per grid step across the
    # three streams; multiple of 8 sublanes (or the full E if E is small).
    per_row = 3 * D * itemsize
    te = max(8, target_step_bytes // per_row)
    te = int(min(te, E))
    if te < E:
        te = max(8, (te // 8) * 8)

    kernel = functools.partial(_edge_kernel, d2=d2)
    out = pl.pallas_call(
        kernel,
        out_shape=jax.ShapeDtypeStruct((E, 1), head.dtype),
        grid=(pl.cdiv(E, te),),          # ragged last block handled by Pallas
        in_specs=[pl.BlockSpec((te, D), lambda i: (i, 0)) for _ in range(3)],
        out_specs=pl.BlockSpec((te, 1), lambda i: (i, 0)),
        compiler_params=pltpu.CompilerParams(
            dimension_semantics=("parallel",)),
    )(head, rel, tail)
    return out[:, 0]  # (E,)


# ---------------------------------------------------------------------------
# Kernel 2: create_neg  -> complex-rotate by the relation, then bmm vs negs
#   neg_tail (neg_head=False): a = heads, b = tails,
#       real = a_re*r_re - a_im*r_im,  imag = a_re*r_im + a_im*r_re
#   neg_head (neg_head=True):  a = tails, b = heads,
#       real = a_re*r_re + a_im*r_im,  imag = a_im*r_re - a_re*r_im
# ---------------------------------------------------------------------------
def _neg_kernel(a_ref, r_ref, b_ref, o_ref, emb_ref, *, d2, conj, mxu_dtype):
    # Hoist the rotation (f32) + lane concat out of the j (negative-tile) loop:
    # it only runs when a new (chunk, row-tile) block arrives.
    @pl.when(pl.program_id(2) == 0)
    def _():
        a = a_ref[...].astype(jnp.float32)       # (tc, D)
        r = r_ref[...].astype(jnp.float32)       # (tc, D)
        a_re, a_im = a[:, :d2], a[:, d2:]
        r_re, r_im = r[:, :d2], r[:, d2:]
        if conj:
            real = a_re * r_re + a_im * r_im
            imag = a_im * r_re - a_re * r_im
        else:
            real = a_re * r_re - a_im * r_im
            imag = a_re * r_im + a_im * r_re
        emb_ref[...] = jnp.concatenate([real, imag], axis=-1).astype(mxu_dtype)

    # Contract the last (hidden) dims of both operands: no b transpose, the
    # MXU consumes b in its native (rows, hidden) lane layout; f32 accumulate.
    score = lax.dot_general(
        emb_ref[...], b_ref[...].astype(mxu_dtype),
        dimension_numbers=(((1,), (1,)), ((), ())),
        preferred_element_type=jnp.float32)       # (tc, tn)
    o_ref[...] = score.astype(o_ref.dtype)


def complex_neg_score(heads, relations, tails, num_chunks, chunk_size,
                      neg_sample_size, neg_head=False,
                      block_c=256, block_n=512, mxu_dtype=None,
                      vmem_budget=24 << 20):
    """ComplExScore.create_neg(neg_head)(heads, relations, tails, ...).

    block_c / block_n are per-generation tuning knobs (v5e: prefer block_c=128
    with a large block_n; v6e: up to 512/512; v7x: keep the default caps for
    the 64 MiB VMEM).  mxu_dtype=jnp.bfloat16 enables the v6e/v7x bf16 MXU
    fast path (f32 accumulation is kept).
    """
    D = heads.shape[1]
    assert D % 2 == 0, "hidden dim must be even ([real || imag])"
    d2 = D // 2
    out_dtype = heads.dtype
    mxu_dtype = np.dtype(mxu_dtype) if mxu_dtype is not None else np.dtype(heads.dtype)
    in_item = np.dtype(heads.dtype).itemsize
    out_item = np.dtype(out_dtype).itemsize
    mxu_item = mxu_dtype.itemsize

    if neg_head:
        a = tails.reshape(num_chunks, chunk_size, D)
        r = relations.reshape(num_chunks, chunk_size, D)
        b = heads.reshape(num_chunks, neg_sample_size, D)
    else:
        a = heads.reshape(num_chunks, chunk_size, D)
        r = relations.reshape(num_chunks, chunk_size, D)
        b = tails.reshape(num_chunks, neg_sample_size, D)

    # Shrink tile caps until the double-buffered working set fits the budget
    # (keeps the pipeline double-buffered on v7x's smaller VMEM as D grows).
    def working_set(tc, tn):
        return (2 * (2 * tc * D * in_item        # a, r blocks (double-buffered)
                     + tn * D * in_item          # b block
                     + tc * tn * out_item)       # output block
                + tc * D * mxu_item)             # emb scratch (single)

    while working_set(block_c, block_n) > vmem_budget and (block_c > 128 or block_n > 128):
        if block_n >= block_c:
            block_n = max(128, block_n // 2)
        else:
            block_c = max(128, block_c // 2)

    # 128-aligned C/N tiles (full MXU M/N); pad the axis only if no aligned
    # divisor exists.  D stays fully in-tile (no K reduction axis).
    tc, cs_pad = _fit_tile(chunk_size, block_c, 128)
    tn, nss_pad = _fit_tile(neg_sample_size, block_n, 128)
    if cs_pad != chunk_size:
        pad = ((0, 0), (0, cs_pad - chunk_size), (0, 0))
        a = jnp.pad(a, pad)
        r = jnp.pad(r, pad)
    if nss_pad != neg_sample_size:
        b = jnp.pad(b, ((0, 0), (0, nss_pad - neg_sample_size), (0, 0)))

    kernel = functools.partial(_neg_kernel, d2=d2, conj=neg_head,
                               mxu_dtype=mxu_dtype)
    out = pl.pallas_call(
        kernel,
        out_shape=jax.ShapeDtypeStruct((num_chunks, cs_pad, nss_pad), out_dtype),
        grid=(num_chunks, cs_pad // tc, nss_pad // tn),
        in_specs=[
            pl.BlockSpec((pl.Squeezed(), tc, D), lambda c, i, j: (c, i, 0)),
            pl.BlockSpec((pl.Squeezed(), tc, D), lambda c, i, j: (c, i, 0)),
            pl.BlockSpec((pl.Squeezed(), tn, D), lambda c, i, j: (c, j, 0)),
        ],
        out_specs=pl.BlockSpec((pl.Squeezed(), tc, tn),
                               lambda c, i, j: (c, i, j)),
        scratch_shapes=[pltpu.VMEM((tc, D), mxu_dtype)],
        # j must stay "arbitrary": the pl.when(j == 0) emb cache relies on each
        # core visiting j == 0 first; megacore sharding lands on c / i instead.
        compiler_params=pltpu.CompilerParams(
            dimension_semantics=("parallel", "parallel", "arbitrary")),
    )(a, r, b)

    if cs_pad != chunk_size or nss_pad != neg_sample_size:
        out = out[:, :chunk_size, :neg_sample_size]
    return out


# TODO(synk): ComplExScore.infer (all-pairs head x rel x tail scorer) is not
# implemented; the module's forward path (edge_func) and create_neg are.


# ---------------------------------------------------------------------------
# Pure-JAX references (mirror the PyTorch code exactly)
# ---------------------------------------------------------------------------
def _ref_edge(head, rel, tail):
    d2 = head.shape[-1] // 2
    re_h, im_h = head[..., :d2], head[..., d2:]
    re_t, im_t = tail[..., :d2], tail[..., d2:]
    re_r, im_r = rel[..., :d2], rel[..., d2:]
    s = (re_h * re_t * re_r + im_h * im_t * re_r
         + re_h * im_t * im_r - im_h * re_t * im_r)
    return jnp.sum(s, -1)


def _ref_neg(heads, relations, tails, nc, cs, nss, neg_head, mxu_dtype=None):
    D = heads.shape[1]
    d2 = D // 2
    rel = relations.astype(jnp.float32)
    r_re, r_im = rel[:, :d2], rel[:, d2:]
    if neg_head:
        e = tails.astype(jnp.float32)
        e_re, e_im = e[:, :d2], e[:, d2:]
        real = e_re * r_re + e_im * r_im
        imag = -e_re * r_im + e_im * r_re
        b = heads.reshape(nc, nss, D)
    else:
        e = heads.astype(jnp.float32)
        e_re, e_im = e[:, :d2], e[:, d2:]
        real = e_re * r_re - e_im * r_im
        imag = e_re * r_im + e_im * r_re
        b = tails.reshape(nc, nss, D)
    emb = jnp.concatenate([real, imag], -1)
    if mxu_dtype is not None:  # emulate reduced-precision MXU operands
        emb = emb.astype(mxu_dtype)
        b = b.astype(mxu_dtype)
    emb = emb.astype(jnp.float32).reshape(nc, cs, D)
    b = b.astype(jnp.float32)
    return jnp.einsum('bcd,bnd->bcn', emb, b)


if __name__ == "__main__":
    key = jax.random.PRNGKey(0)
    D = 32                  # hidden_dim ([real || imag] halves of 16)
    E = 8                   # number of edges (edge_func path)
    NC, CS, NSS = 2, 8, 16  # num_chunks, chunk_size, neg_sample_size

    ks = jax.random.split(key, 12)

    # --- edge_func path ---
    h_e = jax.random.normal(ks[0], (E, D), jnp.float32)
    r_e = jax.random.normal(ks[1], (E, D), jnp.float32)
    t_e = jax.random.normal(ks[2], (E, D), jnp.float32)
    s = complex_edge_score(h_e, r_e, t_e)
    jax.block_until_ready(s)
    ref = _ref_edge(h_e, r_e, t_e)
    assert s.shape == (E,)
    assert jnp.allclose(s, ref, atol=1e-4, rtol=1e-4), "edge_func mismatch"

    # --- edge_func, multi-tile grid with a ragged last block (no input pad)
    E2 = 300
    h_e2 = jax.random.normal(ks[8], (E2, D), jnp.float32)
    r_e2 = jax.random.normal(ks[9], (E2, D), jnp.float32)
    t_e2 = jax.random.normal(ks[10], (E2, D), jnp.float32)
    s = complex_edge_score(h_e2, r_e2, t_e2, target_step_bytes=32 * 1024)
    jax.block_until_ready(s)
    ref = _ref_edge(h_e2, r_e2, t_e2)
    assert s.shape == (E2,)
    assert jnp.allclose(s, ref, atol=1e-4, rtol=1e-4), "edge_func ragged mismatch"

    # --- create_neg, neg_tail: heads/relations (NC*CS, D), tails (NC*NSS, D)
    heads = jax.random.normal(ks[3], (NC * CS, D), jnp.float32)
    rels = jax.random.normal(ks[4], (NC * CS, D), jnp.float32)
    tails = jax.random.normal(ks[5], (NC * NSS, D), jnp.float32)
    s = complex_neg_score(heads, rels, tails, NC, CS, NSS, neg_head=False)
    jax.block_until_ready(s)
    ref = _ref_neg(heads, rels, tails, NC, CS, NSS, False)
    assert s.shape == (NC, CS, NSS)
    assert jnp.allclose(s, ref, atol=1e-3, rtol=1e-3), "neg_tail mismatch"

    # --- create_neg, neg_head: heads (NC*NSS, D) are negatives
    heads2 = jax.random.normal(ks[6], (NC * NSS, D), jnp.float32)
    rels2 = jax.random.normal(ks[4], (NC * CS, D), jnp.float32)
    tails2 = jax.random.normal(ks[7], (NC * CS, D), jnp.float32)
    s = complex_neg_score(heads2, rels2, tails2, NC, CS, NSS, neg_head=True)
    jax.block_until_ready(s)
    ref = _ref_neg(heads2, rels2, tails2, NC, CS, NSS, True)
    assert s.shape == (NC, CS, NSS)
    assert jnp.allclose(s, ref, atol=1e-3, rtol=1e-3), "neg_head mismatch"

    # --- create_neg with a tiled negative axis (exercises the j-loop + the
    #     pl.when(j == 0) cached-rotation scratch path)
    NC2, CS2, NSS2 = 1, 8, 640
    heads3 = jax.random.normal(ks[11], (NC2 * CS2, D), jnp.float32)
    rels3 = jax.random.normal(ks[1], (NC2 * CS2, D), jnp.float32)
    tails3 = jax.random.normal(ks[2], (NC2 * NSS2, D), jnp.float32)
    s = complex_neg_score(heads3, rels3, tails3, NC2, CS2, NSS2, neg_head=False)
    jax.block_until_ready(s)
    ref = _ref_neg(heads3, rels3, tails3, NC2, CS2, NSS2, False)
    assert s.shape == (NC2, CS2, NSS2)
    assert jnp.allclose(s, ref, atol=1e-3, rtol=1e-3), "neg tiled-j mismatch"

    # --- same, with bf16 MXU operands (v6e/v7x fast path), checked against a
    #     bf16-rounded reference (f32 accumulation in both)
    s_bf = complex_neg_score(heads3, rels3, tails3, NC2, CS2, NSS2,
                             neg_head=False, mxu_dtype=jnp.bfloat16)
    jax.block_until_ready(s_bf)
    ref_bf = _ref_neg(heads3, rels3, tails3, NC2, CS2, NSS2, False,
                      mxu_dtype=jnp.bfloat16)
    assert jnp.allclose(s_bf, ref_bf, atol=2e-3, rtol=2e-3), "neg bf16 mismatch"

    print("KERNEL_OK")
</pallas_src>

<mosaic_0001>
module attributes {stable_mosaic.version = 11 : i64} {
  func.func @_edge_kernel(%arg0: i32, %arg1: memref<8x32xf32, #tpu.memory_space<vmem>>, %arg2: memref<8x32xf32, #tpu.memory_space<vmem>>, %arg3: memref<8x32xf32, #tpu.memory_space<vmem>>, %arg4: memref<8x1xf32, #tpu.memory_space<vmem>>) attributes {dimension_semantics = [#tpu.dimension_semantics<parallel>], iteration_bounds = array<i64: 1>, scalar_prefetch = 0 : i64, scratch_operands = 0 : i64, tpu.core_type = #tpu.core_type<tc>, window_params = [{transform_indices = @transform_0, window_bounds = array<i64: 8, 32>}, {transform_indices = @transform_1, window_bounds = array<i64: 8, 32>}, {transform_indices = @transform_2, window_bounds = array<i64: 8, 32>}, {transform_indices = @transform_3, window_bounds = array<i64: 8, 1>}]} {
    %c0 = arith.constant 0 : index
    %c0_0 = arith.constant 0 : index
    %0 = vector.load %arg1[%c0, %c0_0] : memref<8x32xf32, #tpu.memory_space<vmem>>, vector<8x32xf32>
    %c0_1 = arith.constant 0 : index
    %c0_2 = arith.constant 0 : index
    %1 = vector.load %arg2[%c0_1, %c0_2] : memref<8x32xf32, #tpu.memory_space<vmem>>, vector<8x32xf32>
    %c0_3 = arith.constant 0 : index
    %c0_4 = arith.constant 0 : index
    %2 = vector.load %arg3[%c0_3, %c0_4] : memref<8x32xf32, #tpu.memory_space<vmem>>, vector<8x32xf32>
    %3 = vector.extract_strided_slice %0 {offsets = [0, 0], sizes = [8, 16], strides = [1, 1]} : vector<8x32xf32> to vector<8x16xf32>
    %4 = vector.extract_strided_slice %0 {offsets = [0, 16], sizes = [8, 16], strides = [1, 1]} : vector<8x32xf32> to vector<8x16xf32>
    %5 = vector.extract_strided_slice %2 {offsets = [0, 0], sizes = [8, 16], strides = [1, 1]} : vector<8x32xf32> to vector<8x16xf32>
    %6 = vector.extract_strided_slice %2 {offsets = [0, 16], sizes = [8, 16], strides = [1, 1]} : vector<8x32xf32> to vector<8x16xf32>
    %7 = vector.extract_strided_slice %1 {offsets = [0, 0], sizes = [8, 16], strides = [1, 1]} : vector<8x32xf32> to vector<8x16xf32>
    %8 = vector.extract_strided_slice %1 {offsets = [0, 16], sizes = [8, 16], strides = [1, 1]} : vector<8x32xf32> to vector<8x16xf32>
    %9 = arith.mulf %3, %5 : vector<8x16xf32>
    %10 = arith.mulf %4, %6 : vector<8x16xf32>
    %11 = arith.addf %9, %10 : vector<8x16xf32>
    %12 = arith.mulf %7, %11 : vector<8x16xf32>
    %13 = arith.mulf %3, %6 : vector<8x16xf32>
    %14 = arith.mulf %4, %5 : vector<8x16xf32>
    %15 = arith.subf %13, %14 : vector<8x16xf32>
    %16 = arith.mulf %8, %15 : vector<8x16xf32>
    %17 = arith.addf %12, %16 : vector<8x16xf32>
    %cst = arith.constant dense<0.000000e+00> : vector<8xf32>
    %18 = vector.multi_reduction <add>, %17, %cst [1] : vector<8x16xf32> to vector<8xf32>
    %19 = vector.shape_cast %18 : vector<8xf32> to vector<8x1xf32>
    %c0_5 = arith.constant 0 : index
    %c0_6 = arith.constant 0 : index
    %20 = vector.load %arg4[%c0_5, %c0_6] : memref<8x1xf32, #tpu.memory_space<vmem>>, vector<8x1xf32>
    tpu.vector_store %arg4[%c0_5, %c0_6], %19 {strides = array<i32>} : memref<8x1xf32, #tpu.memory_space<vmem>>, vector<8x1xf32>,
    return
  }
  func.func @transform_0(%arg0: i32) -> (i32, i32) {
    %c0_i32 = arith.constant 0 : i32
    %c0_i32_0 = arith.constant 0 : i32
    return %arg0, %c0_i32 : i32, i32
  }
  func.func @transform_1(%arg0: i32) -> (i32, i32) {
    %c0_i32 = arith.constant 0 : i32
    %c0_i32_0 = arith.constant 0 : i32
    return %arg0, %c0_i32 : i32, i32
  }
  func.func @transform_2(%arg0: i32) -> (i32, i32) {
    %c0_i32 = arith.constant 0 : i32
    %c0_i32_0 = arith.constant 0 : i32
    return %arg0, %c0_i32 : i32, i32
  }
  func.func @transform_3(%arg0: i32) -> (i32, i32) {
    %c0_i32 = arith.constant 0 : i32
    %c0_i32_0 = arith.constant 0 : i32
    return %arg0, %c0_i32 : i32, i32
  }
}

</mosaic_0001>

<bundles_post_ra>
// kernel: tpu_custom_call.1
= control target key start
LH: loop header
LB: loop body
LE: loop exit
PB: predicated region body
PF: predicated region fallthrough
CT: control target
= control target key end

     0   :  { %8 = vsyncpa [#allocation3], 0  ;;  %s234_s0 = inlined_call_operand.hbm [shape: f32[8,32], index: 0, kind: input, shape index: {}]   ;;  %s235_s1 = inlined_call_operand.hbm [shape: f32[8,32], index: 1, kind: input, shape index: {}]   ;;  %s236_s2 = inlined_call_operand.hbm [shape: f32[8,32], index: 2, kind: input, shape index: {}]   ;;  %s237_s3 = inlined_call_operand.vmem [shape: f32[8,1], index: 3, kind: output, shape index: {}]  }
   0x1   :  { %9 = vsyncpa [#allocation5], 0  ;;  %s170_s12 = smov [#allocation4]   ;;  %s171_s14 = smov [#allocation2]  }
   0x2   :  { %s26_s13 = sshll.u32 %s170_s12, 4  ;;  %s16_s15 = sshll.u32 %s171_s14, 4  ;;  %s27_s13 = int_to_ptr.vmem [resolvable:$true] %s26_s13  ;;  %s17_s15 = int_to_ptr.vmem [resolvable:$true] %s16_s15 }
   0x3   :  { %s100_s18 = scalar_lea.hbm %s235_s1, 128 }
   0x4   :  { %p101_p0 = scmp.ne.s32.totalorder %s235_s1, %s100_s18  ;;  %p104_p1 = scmp.lt.u32.totalorder %s100_s18, %s235_s1 }
   0x6   :  { %p106_p2 = pnand %p104_p1, %p101_p0 }
   0x8   :  { %109 = shalt.err (!%p106_p2)
}
   0x9   :  { %s110_s23 = scalar_lea.vmem %s27_s13, 128  ;;  %p115_p4 = scmp.lt.s32.totalorder %s27_s13, %s27_s13 }
   0xa   :  { %p111_p3 = scmp.ne.s32.totalorder %s27_s13, %s110_s23  ;;  %p116_p5 = scmp.lt.s32.totalorder %s110_s23, %s110_s23 }
   0xc   :  { %p117_p6 = por %p116_p5, %p115_p4 }
   0xe   :  { %p118_p7 = pnand %p117_p6, %p111_p3 }
  0x10   :  { %121 = shalt.err (!%p118_p7)
}
  0x11   :  { %29 = dma.hbm_to_vmem [thread:$0]  %s235_s1, 128, %s27_s13, [#allocation5]  }
  0x12   :  { %s122_s28 = scalar_lea.hbm %s234_s0, 128 }
  0x13   :  { %p123_p8 = scmp.ne.s32.totalorder %s234_s0, %s122_s28  ;;  %p126_p9 = scmp.lt.u32.totalorder %s122_s28, %s234_s0 }
  0x15   :  { %p128_p10 = pnand %p126_p9, %p123_p8 }
  0x17   :  { %131 = shalt.err (!%p128_p10)
}
  0x18   :  { %s132_s6 = scalar_lea.vmem %s17_s15, 128  ;;  %p137_p12 = scmp.lt.s32.totalorder %s17_s15, %s17_s15 }
  0x19   :  { %p133_p11 = scmp.ne.s32.totalorder %s17_s15, %s132_s6  ;;  %p138_p13 = scmp.lt.s32.totalorder %s132_s6, %s132_s6 }
  0x1b   :  { %p139_p0 = por %p138_p13, %p137_p12 }
  0x1d   :  { %p140_p1 = pnand %p139_p0, %p133_p11 }
  0x1f   :  { %143 = shalt.err (!%p140_p1)
}
  0x20   :  { %19 = dma.hbm_to_vmem [thread:$0]  %s234_s0, 128, %s17_s15, [#allocation3]  }
  0x21   :  { %s172_s8 = smov [#allocation6]   ;;  %s144_s12 = scalar_lea.hbm %s236_s2, 128 }
  0x22   :  { %s36_s9 = sshll.u32 %s172_s8, 4  ;;  %p145_p2 = scmp.ne.s32.totalorder %s236_s2, %s144_s12  ;;  %s37_s9 = int_to_ptr.vmem [resolvable:$true] %s36_s9 }
  0x23   :  { %p148_p3 = scmp.lt.u32.totalorder %s144_s12, %s236_s2 }
  0x25   :  { %p150_p4 = pnand %p148_p3, %p145_p2 }
  0x27   :  { %153 = shalt.err (!%p150_p4)
}
  0x28   :  { %s154_s18 = scalar_lea.vmem %s37_s9, 128  ;;  %p159_p6 = scmp.lt.s32.totalorder %s37_s9, %s37_s9 }
  0x29   :  { %p155_p5 = scmp.ne.s32.totalorder %s37_s9, %s154_s18  ;;  %p160_p7 = scmp.lt.s32.totalorder %s154_s18, %s154_s18 }
  0x2b   :  { %p161_p8 = por %p160_p7, %p159_p6 }
  0x2d   :  { %p162_p9 = pnand %p161_p8, %p155_p5 }
  0x2f   :  { %165 = shalt.err (!%p162_p9)
}
  0x30   :  { %39 = dma.hbm_to_vmem [thread:$0]  %s236_s2, 128, %s37_s9, [#allocation5]  }
  0x31   :  { %166 = dma.done.wait [#allocation3], 128  }
  0x32   :  { %167 = vsyncadd [#allocation3], 4294967168 }
  0x33   :  { %168 = dma.done.wait [#allocation5], 256  }
  0x34   :  { %169 = vsyncadd [#allocation5], 4294967040  ;;  %v51_v0 = vld [vmem:[#allocation6] sm:$0xff]  ;;  %s173_s19 = smov 16   ;;  %s174_s20 = smov 112   ;;  %v49_v1 = vld [vmem:[#allocation2] sm:$0xff] }
  0x35   :  { %64 = vrot.lane.b32.xlu0 %v51_v0, %s173_s19  ;;  %v52_v2 = vmul.f32 %v51_v0, %v49_v1  ;;  %v50_v9 = vld [vmem:[#allocation4] sm:$0xff]  ;;  %vm83_vm0 = vcmask 130048   ;;  %vm87_vm1 = vcmask 7168  }
  0x39   :  { %60 = vrot.lane.b32.xlu0 %v51_v0, %s174_s20 }
  0x3d   :  { %54 = vrot.lane.b32.xlu0 %v52_v2, %s174_s20 }
  0xa7   :  { %v65_v3 = vpop.permute.xlu0 %64 }
  0xa8   :  { %v67_v4 = vmul.f32 %v65_v3, %v49_v1 }
  0xaa   :  { %69 = vrot.lane.b32.xlu1 %v67_v4, %s174_s20 }
  0xab   :  { %v61_v5 = vpop.permute.xlu0 %60 }
  0xac   :  { %v63_v6 = vmul.f32 %v61_v5, %v49_v1 }
  0xaf   :  { %v55_v12 = vpop.permute.xlu0 %54 }
  0xb0   :  { %v57_v13 = vadd.f32 %v55_v12, %v52_v2 }
  0xb2   :  { %v58_v14 = vmul.f32 %v57_v13, %v50_v9 }
 0x11c   :  { %v70_v7 = vpop.permute.xlu1 %69 }
 0x11d   :  { %v72_v8 = vsub.f32 %v63_v6, %v70_v7 }
 0x11f   :  { %74 = vrot.lane.b32.xlu1 %v72_v8, %s173_s19 }
 0x191   :  { %v75_v10 = vpop.permute.xlu1 %74 }
 0x192   :  { %v77_v11 = vmul.f32 %v75_v10, %v50_v9 }
 0x194   :  { %79 = vrot.lane.b32.xlu1 %v77_v11, %s174_s20 }
 0x206   :  { %v80_v15 = vpop.permute.xlu1 %79 }
 0x207   :  { %v82_v16 = vadd.f32 %v80_v15, %v58_v14 }
 0x209   :  { %v84_v17 = vsel %vm83_vm0, %v82_v16, 0.0 }
 0x20a   :  { %85 = vadd.xlane.f32.xlu0 %v84_v17 }
 0x297   :  { %v86_v18 = vpop.xlane.xlu0 %85 }
 0x298   :  { %88 = vst.msk [vmem:[%s237_s3] sm:$0xff] %vm87_vm1, %v86_v18 }
 0x299   :  { %93 = vsyncpa [#allocation3], 1 }
 0x29a   :  { %94 = vsyncpa [#allocation5], 1 }

</bundles_post_ra>
